<compile_context>
chip_gen: v7x
topology: tpu7x:2x2x1
jax: 0.10.0
libtpu: 0.0.40
codegen_flags: <defaults>
</compile_context>

<pallas_src>
import math

import jax
import jax.numpy as jnp
from jax.experimental import pallas as pl
from jax.experimental.pallas import tpu as pltpu


# ---------------------------------------------------------------------------
# Kernel 1: mean over the sequence axis  (== torch.mean(h_path, dim=1))
#   grid = (C-tiles, N-tiles); N (reduction) is the last grid axis.  Per step
#   a VALU-only partial sum lands in an (B, 8, tc) f32 scratch; the single
#   cross-sublane reduce + *1/N happen on the final step.
# ---------------------------------------------------------------------------
def _make_seq_mean_kernel(N, tn, tc):
    need_mask = (N % tn) != 0
    inv_n = 1.0 / float(N)
    sublane_partial = (tn % 8 == 0)

    def kernel(x_ref, o_ref, acc_ref):
        k = pl.program_id(1)

        @pl.when(k == 0)
        def _():
            acc_ref[...] = jnp.zeros_like(acc_ref)

        x = x_ref[...].astype(jnp.float32)                    # (B, tn, tc)
        if need_mask:  # static: only emitted when the tail block is partial
            rows = jax.lax.broadcasted_iota(jnp.int32, x.shape, 1) + k * tn
            x = jnp.where(rows < N, x, 0.0)

        b = x.shape[0]
        if sublane_partial:
            # VALU-only partial accumulation into 8 sublane bins; the
            # cross-sublane (XLU) reduce is deferred to the finalize step.
            acc_ref[...] += jnp.sum(x.reshape(b, tn // 8, 8, tc), axis=1)
        else:
            # tn == N and N % 8 != 0  ->  single reduction step anyway.
            acc_ref[:, 0:1, :] += jnp.sum(x, axis=1, keepdims=True)

        @pl.when(k == pl.num_programs(1) - 1)
        def _():
            o_ref[...] = (jnp.sum(acc_ref[...], axis=1) * inv_n).astype(o_ref.dtype)

    return kernel


def seq_mean(h_path, *, tn=None, tc=None):
    B, N, C = h_path.shape
    itemsize = h_path.dtype.itemsize

    # Lane (channel) tile: lane-dense, divides C, and — where it is free —
    # gives the parallel grid axis >= 2 steps so both v7x TensorCores get work.
    if tc is None:
        if C % 128 == 0:
            tc = 128
            for cand in (512, 384, 256, 128):
                if cand <= C and C % cand == 0:
                    tc = cand
                    break
            if C // tc < 2 and (C // 2) % 128 == 0:
                tc = C // 2
        else:
            tc = C
    assert C % tc == 0

    # Sequence (reduction) tile: cap the input block at ~4 MiB so with double
    # buffering + the accumulator it fits every generation's scoped-VMEM
    # budget (16 MiB v5e default, 32 MiB v6e/v7x scoped, 64 MiB v7x physical).
    # tn is a multiple of 8 unless it covers all of N (keeps the (8,128)
    # BlockSpec rule satisfied in both cases).
    if tn is None:
        bytes_per_row = max(1, B * tc * itemsize)
        cap_rows = max(8, (4 * 1024 * 1024) // bytes_per_row)
        if N <= cap_rows:
            tn = N
        else:
            tn = max(8, (cap_rows // 8) * 8)

    in_blk = B * tn * tc * itemsize
    out_blk = B * tc * itemsize
    acc_blk = B * 8 * tc * 4
    vmem_limit = int(min(64 * 2 ** 20,
                         max(8 * 2 ** 20,
                             2 * in_blk + 2 * out_blk + acc_blk + (2 << 20))))

    kernel = _make_seq_mean_kernel(N, tn, tc)
    return pl.pallas_call(
        kernel,
        out_shape=jax.ShapeDtypeStruct((B, C), h_path.dtype),
        grid_spec=pltpu.PrefetchScalarGridSpec(
            num_scalar_prefetch=0,
            grid=(C // tc, pl.cdiv(N, tn)),
            in_specs=[pl.BlockSpec((B, tn, tc), lambda c, k: (0, k, c))],
            out_specs=pl.BlockSpec((B, tc), lambda c, k: (0, c)),
            scratch_shapes=[pltpu.VMEM((B, 8, tc), jnp.float32)],
        ),
        compiler_params=pltpu.CompilerParams(
            dimension_semantics=("parallel", "arbitrary"),
            vmem_limit_bytes=vmem_limit),
    )(h_path)


# ---------------------------------------------------------------------------
# Kernel 2: PPEG positional encoding
#   out = dwconv7(x) + x + dwconv5(x) + dwconv3(x)  (depthwise, "same" pad),
#   folded into a single 7x7 depthwise stencil (identity at the center tap).
#   The 3-pixel halo is built in-kernel in a VMEM scratch (no HBM pad pass),
#   and the 49 taps accumulate into a per-row-group register-resident f32
#   accumulator that is stored exactly once per group.
# ---------------------------------------------------------------------------
K = 7          # folded kernel size
PAD = K // 2   # 3


def fold_ppeg_weights(params):
    """Fold w7 + w5 + w3 (+ identity residual) into one (49, C) f32 stencil."""
    C = params["w7"].shape[-1]
    w = params["w7"].astype(jnp.float32)
    w = w.at[1:6, 1:6, :].add(params["w5"].astype(jnp.float32))
    w = w.at[2:5, 2:5, :].add(params["w3"].astype(jnp.float32))
    w = w.at[3, 3, :].add(1.0)                                  # identity residual
    bsum = (params["b7"] + params["b5"] + params["b3"]).astype(jnp.float32)
    return w.reshape(K * K, C), bsum.reshape(1, C)


def _make_ppeg_kernel(H, W, tc, cdtype):
    Hp, Wp = H + 2 * PAD, W + 2 * PAD
    # Output rows are processed in groups whose f32 accumulator targets the
    # vreg file (~48 KiB), so each output element is stored exactly once
    # instead of round-tripping VMEM for all 49 taps.
    rg = max(1, min(H, 8, (48 * 1024) // max(1, W * tc * 4)))
    groups = []
    r = 0
    while r < H:
        rn = min(rg, H - r)
        groups.append((r, rn))
        r += rn

    def kernel(x_ref, w_ref, b_ref, o_ref, xpad_ref):
        # In-kernel zero-padded halo (VMEM scratch) — no jnp.pad HBM pre-pass.
        xpad_ref[...] = jnp.zeros_like(xpad_ref)
        xpad_ref[:, PAD:PAD + H, PAD:PAD + W, :] = x_ref[...].astype(cdtype)

        w = w_ref[...].astype(cdtype)            # (49, tc), taps in compute dtype
        bias = b_ref[...]                        # (1, tc) f32

        for r0, rn in groups:                    # static python loop over row groups
            acc = jnp.broadcast_to(bias.reshape(1, 1, 1, tc), (1, rn, W, tc))
            for j in range(K):
                # One small misaligned-sublane slice per j per group, hoisted
                # over the 7 i-taps; the i-slices below are tile-granular.
                # TODO(synk): move this W shift onto the XLU with pltpu.roll.
                xj = xpad_ref[:, r0:r0 + rn + 2 * PAD, j:j + W, :]
                for i in range(K):
                    acc = acc + xj[:, i:i + rn, :, :] * w[i * K + j]
            o_ref[:, r0:r0 + rn] = acc.astype(o_ref.dtype)

    return kernel


def ppeg(x_seq, H, W, params, *, tc=None):
    """PPEG.forward: (B, H*W, C) -> (B, H*W, C), NHWC internally."""
    B, N2, C = x_seq.shape
    assert N2 == H * W
    if tc is None:
        tc = 128 if C % 128 == 0 else C
    assert C % tc == 0

    # bf16 inputs keep bf16 tap multiplies (bf16 VALU on v6e/v7x); otherwise
    # promote once to f32.  Accumulation is always f32.
    cdtype = jnp.bfloat16 if x_seq.dtype == jnp.bfloat16 else jnp.float32

    x = x_seq.reshape(B, H, W, C)    # same n -> (h, w) mapping as the NCHW view
    w_flat, bsum = fold_ppeg_weights(params)
    Hp, Wp = H + 2 * PAD, W + 2 * PAD

    io_blk = H * W * tc * x_seq.dtype.itemsize
    pad_blk = Hp * Wp * tc * jnp.dtype(cdtype).itemsize
    wb_blk = (K * K + 1) * tc * 4
    vmem_limit = int(min(64 * 2 ** 20,
                         max(16 * 2 ** 20,
                             4 * io_blk + pad_blk + 2 * wb_blk + (4 << 20))))
    # TODO(synk): for WSI-scale H*W, add a halo'd spatial grid axis so the
    # per-step block stays within v7x's 64 MiB VMEM.

    kernel = _make_ppeg_kernel(H, W, tc, cdtype)
    out = pl.pallas_call(
        kernel,
        out_shape=jax.ShapeDtypeStruct((B, H, W, C), x_seq.dtype),
        grid_spec=pltpu.PrefetchScalarGridSpec(
            num_scalar_prefetch=0,
            # b is the fastest grid axis so the (49, tc)/(1, tc) weight blocks
            # keep the same block index on the inner loop (no re-DMA).
            grid=(C // tc, B),
            in_specs=[
                pl.BlockSpec((1, H, W, tc), lambda c, b: (b, 0, 0, c)),
                pl.BlockSpec((K * K, tc), lambda c, b: (0, c)),
                pl.BlockSpec((1, tc), lambda c, b: (0, c)),
            ],
            out_specs=pl.BlockSpec((1, H, W, tc), lambda c, b: (b, 0, 0, c)),
            scratch_shapes=[pltpu.VMEM((1, Hp, Wp, tc), cdtype)],
        ),
        compiler_params=pltpu.CompilerParams(
            dimension_semantics=("parallel", "parallel"),
            vmem_limit_bytes=vmem_limit),
    )(x, w_flat, bsum)
    return out.reshape(B, N2, C)


# ---------------------------------------------------------------------------
# pathMIL forward (model_type='TransMIL')
# ---------------------------------------------------------------------------
@jax.jit
def pathmil_forward(h_path):
    # Reference forward: the translayer1 -> PPEG -> translayer2 chain is
    # computed into h_path_sa but then overwritten by torch.mean(h_path, dim=1),
    # so it never affects the returned value.  We emit only the output-
    # determining reduction.
    # TODO(synk): translayer1/translayer2 use NystromAttention whose source is
    # not provided; their (discarded) computation is not reproduced here.
    return seq_mean(h_path)


if __name__ == "__main__":
    key = jax.random.PRNGKey(0)
    k_x, k_w7, k_w5, k_w3, k_b7, k_b5, k_b3 = jax.random.split(key, 7)

    B, N, C = 2, 8, 256  # batch=2, seq=8, input_dim=256 (module default)
    h_path = jax.random.normal(k_x, (B, N, C), dtype=jnp.float32)

    # Deterministic synthetic PPEG parameters (Conv2d(dim, dim, k, groups=dim) + bias).
    params = {
        "w7": 0.05 * jax.random.normal(k_w7, (7, 7, C), dtype=jnp.float32),
        "w5": 0.05 * jax.random.normal(k_w5, (5, 5, C), dtype=jnp.float32),
        "w3": 0.05 * jax.random.normal(k_w3, (3, 3, C), dtype=jnp.float32),
        "b7": 0.05 * jax.random.normal(k_b7, (C,), dtype=jnp.float32),
        "b5": 0.05 * jax.random.normal(k_b5, (C,), dtype=jnp.float32),
        "b3": 0.05 * jax.random.normal(k_b3, (C,), dtype=jnp.float32),
    }

    # --- hot path: returned value == mean over dim=1 of the input ---
    out = jax.block_until_ready(pathmil_forward(h_path))
    assert out.shape == (B, C)
    assert jnp.allclose(out, jnp.mean(h_path, axis=1), rtol=1e-5, atol=1e-5)

    # --- correctness of the PPEG kernel against lax depthwise convolutions ---
    _H = _W = int(math.ceil(math.sqrt(N)))
    add_length = _H * _W - N
    h_sa = jnp.concatenate([h_path, h_path[:, :add_length, :]], axis=1)
    ppeg_out = jax.block_until_ready(ppeg(h_sa, _H, _W, params))
    x_nhwc = h_sa.reshape(B, _H, _W, C)

    def dw(x, w, b, k):
        y = jax.lax.conv_general_dilated(
            x, w.reshape(k, k, 1, C), (1, 1), "SAME",
            dimension_numbers=("NHWC", "HWIO", "NHWC"),
            feature_group_count=C)
        return y + b

    ppeg_ref = (dw(x_nhwc, params["w7"], params["b7"], 7) + x_nhwc
                + dw(x_nhwc, params["w5"], params["b5"], 5)
                + dw(x_nhwc, params["w3"], params["b3"], 3)).reshape(B, _H * _W, C)
    assert jnp.allclose(ppeg_out, ppeg_ref, rtol=1e-4, atol=1e-4)

    print("KERNEL_OK")
</pallas_src>

<mosaic_0001>
module attributes {stable_mosaic.version = 11 : i64} {
  func.func @kernel(%arg0: i32, %arg1: i32, %arg2: memref<2x8x128xf32, #tpu.memory_space<vmem>>, %arg3: memref<2x128xf32, #tpu.memory_space<vmem>>, %arg4: memref<2x8x128xf32, #tpu.memory_space<vmem>>) attributes {dimension_semantics = [#tpu.dimension_semantics<parallel>, #tpu.dimension_semantics<arbitrary>], iteration_bounds = array<i64: 2, 1>, scalar_prefetch = 0 : i64, scratch_operands = 1 : i64, tpu.core_type = #tpu.core_type<tc>, window_params = [{transform_indices = @transform_0, window_bounds = array<i64: 2, 8, 128>}, {transform_indices = @transform_1, window_bounds = array<i64: 2, 128>}]} {
    %c0_i32 = arith.constant 0 : i32
    %0 = arith.cmpi eq, %arg1, %c0_i32 : i32
    %1 = arith.extui %0 : i1 to i32
    %c0_i32_0 = arith.constant 0 : i32
    %2 = arith.cmpi ne, %1, %c0_i32_0 : i32
    scf.if %2 {
      %cst_11 = arith.constant 0.000000e+00 : f32
      %12 = vector.broadcast %cst_11 : f32 to vector<2x8x128xf32>
      %c0_12 = arith.constant 0 : index
      %c0_13 = arith.constant 0 : index
      %c0_14 = arith.constant 0 : index
      %13 = vector.load %arg4[%c0_12, %c0_13, %c0_14] : memref<2x8x128xf32, #tpu.memory_space<vmem>>, vector<2x8x128xf32>
      tpu.vector_store %arg4[%c0_12, %c0_13, %c0_14], %12 {strides = array<i32>} : memref<2x8x128xf32, #tpu.memory_space<vmem>>, vector<2x8x128xf32>,
    } else {
    }
    %c0 = arith.constant 0 : index
    %c0_1 = arith.constant 0 : index
    %c0_2 = arith.constant 0 : index
    %3 = vector.load %arg2[%c0, %c0_1, %c0_2] : memref<2x8x128xf32, #tpu.memory_space<vmem>>, vector<2x8x128xf32>
    %c0_3 = arith.constant 0 : index
    %c0_4 = arith.constant 0 : index
    %c0_5 = arith.constant 0 : index
    %4 = vector.load %arg4[%c0_3, %c0_4, %c0_5] : memref<2x8x128xf32, #tpu.memory_space<vmem>>, vector<2x8x128xf32>
    %5 = vector.shape_cast %3 : vector<2x8x128xf32> to vector<2x1x8x128xf32>
    %cst = arith.constant dense<0.000000e+00> : vector<2x8x128xf32>
    %6 = vector.multi_reduction <add>, %5, %cst [1] : vector<2x1x8x128xf32> to vector<2x8x128xf32>
    %7 = arith.addf %4, %6 : vector<2x8x128xf32>
    %c0_6 = arith.constant 0 : index
    %c0_7 = arith.constant 0 : index
    %c0_8 = arith.constant 0 : index
    %8 = vector.load %arg4[%c0_6, %c0_7, %c0_8] : memref<2x8x128xf32, #tpu.memory_space<vmem>>, vector<2x8x128xf32>
    tpu.vector_store %arg4[%c0_6, %c0_7, %c0_8], %7 {strides = array<i32>} : memref<2x8x128xf32, #tpu.memory_space<vmem>>, vector<2x8x128xf32>,
    %c0_i32_9 = arith.constant 0 : i32
    %9 = arith.cmpi eq, %arg1, %c0_i32_9 : i32
    %10 = arith.extui %9 : i1 to i32
    %c0_i32_10 = arith.constant 0 : i32
    %11 = arith.cmpi ne, %10, %c0_i32_10 : i32
    scf.if %11 {
      %c0_11 = arith.constant 0 : index
      %c0_12 = arith.constant 0 : index
      %c0_13 = arith.constant 0 : index
      %12 = vector.load %arg4[%c0_11, %c0_12, %c0_13] : memref<2x8x128xf32, #tpu.memory_space<vmem>>, vector<2x8x128xf32>
      %cst_14 = arith.constant dense<0.000000e+00> : vector<2x128xf32>
      %13 = vector.multi_reduction <add>, %12, %cst_14 [1] : vector<2x8x128xf32> to vector<2x128xf32>
      %cst_15 = arith.constant 1.250000e-01 : f32
      %14 = vector.broadcast %cst_15 : f32 to vector<2x128xf32>
      %15 = arith.mulf %13, %14 : vector<2x128xf32>
      %c0_16 = arith.constant 0 : index
      %c0_17 = arith.constant 0 : index
      %16 = vector.load %arg3[%c0_16, %c0_17] : memref<2x128xf32, #tpu.memory_space<vmem>>, vector<2x128xf32>
      tpu.vector_store %arg3[%c0_16, %c0_17], %15 {strides = array<i32>} : memref<2x128xf32, #tpu.memory_space<vmem>>, vector<2x128xf32>,
    } else {
    }
    return
  }
  func.func @transform_0(%arg0: i32, %arg1: i32) -> (i32, i32, i32) {
    %c0_i32 = arith.constant 0 : i32
    %c0_i32_0 = arith.constant 0 : i32
    return %c0_i32, %arg1, %arg0 : i32, i32, i32
  }
  func.func @transform_1(%arg0: i32, %arg1: i32) -> (i32, i32) {
    %c0_i32 = arith.constant 0 : i32
    %c0_i32_0 = arith.constant 0 : i32
    return %c0_i32, %arg0 : i32, i32
  }
}

</mosaic_0001>

<bundles_post_ra>
// kernel: pathmil_forward.1
= control target key start
LH: loop header
LB: loop body
LE: loop exit
PB: predicated region body
PF: predicated region fallthrough
CT: control target
= control target key end

     0   :  { %6 = vsyncpa [#allocation4], 0  ;;  %s664_s0 = inlined_call_operand.hbm [shape: f32[2,8,256], index: 0, kind: input, shape index: {}]   ;;  %s665_s1 = inlined_call_operand.hbm [shape: f32[2,256], index: 1, kind: output, shape index: {}]  }
   0x1   :  { %8 = vsyncpa [#allocation4 + $0x1], 0 }
   0x2   :  { %9 = vsyncpa [#allocation5], 0 }
   0x3   :  { %11 = vsyncpa [#allocation5 + $0x1], 0  ;;  %s492_s6 = smov 0   ;;  %s494_s7 = smov 0  }
   0x4   :  { %s496_s8 = smov 0   ;;  %s498_s9 = smov 0  }
   0x5   :  { %s500_s10 = smov 0   ;;  %s502_s11 = smov 0  }
   0x6 LB: > { %s285_s12 = sadd.s32 4294967295, %s475_s11   ;;  %s286_s13 = sadd.s32 4294967294, %s475_s11   ;;  %s475_s11 = sphi %s502_s11, %s17_s11   ;;  %s471_s10 = sphi %s500_s10, %s679_s10   ;;  %s467_s9 = sphi %s498_s9, %s678_s9   ;;  %s463_s8 = sphi %s496_s8, %s677_s8   ;;  %s459_s7 = sphi %s494_s7, %s676_s7   ;;  %s455_s6 = sphi %s492_s6, %s675_s6  }
   0x7   : > { %s29_s14 = sadd.s32 1, %s471_s10  ;;  %s38_s15 = sadd.s32 1, %s463_s8 }
   0x8   : > { %p31_p0 = scmp.ge.s32.totalorder %s29_s14, 2  ;;  %p45_p1 = scmp.ne.s32.totalorder %s463_s8, %s459_s7 }
   0x9   : > { %p46_p2 = scmp.eq.s32.totalorder %s475_s11, 0  ;;  %p51_p3 = scmp.ne.s32.totalorder %s459_s7, %s455_s6 }
   0xa   : > { %s681_s14 = smov (%p31_p0, %s29_s14), 0  ;;  %p52_p5 = scmp.eq.s32.totalorder %s285_s12, 0 }
   0xb   : > { %p533_p4 = por %p46_p2, %p45_p1  ;;  %s34_s17 = ssub.s32 %s471_s10, %s681_s14 }
   0xc   : > { %p75_p6 = scmp.eq.s32.totalorder %s285_s12, 1  ;;  %p36_p7 = scmp.eq.s32.totalorder %s34_s17, 0 }
   0xd   : > { %p539_p8 = por %p52_p5, %p51_p3  ;;  %p81_p10 = scmp.eq.s32.totalorder %s286_s13, 1 }
   0xe   : > { %p543_p9 = por %p75_p6, %p45_p1  ;;  %p310_p13 = scmp.lt.s32.totalorder %s475_s11, 2 }
   0xf   : > { %s548_s20 = scalar_select %p36_p7, %s463_s8, %s38_s15  }
  0x10   : > { %s669_s19 = scalar_select %p543_p9, 1, 0 }
  0x11   : > { %p550_p11 = por %p81_p10, %p51_p3  ;;  %s101_s22 = sand.u32 1, %s463_s8  }
  0x12   : > { %s289_s23 = sshll.u32 %s101_s22, 4  ;;  %s290_s24 = sshll.u32 %s471_s10, 7 }
  0x13   : > { %s670_s21 = scalar_select %p550_p11, 1, 0 }
  0x14   : > { %s561_s27 = scalar_lea.hbm %s664_s0, %s290_s24  ;;  %s105_s28 = scalar_lea.vmem [#allocation3], %s289_s23 }
  0x15   : > { %s113_s29 = sshll.u32 %s105_s28, 4  ;;  %p567_p0 = pnand %p310_p13, %p533_p4  ;;  %s563_s29 = int_to_ptr.vmem [resolvable:$true] %s113_s29 }
  0x16   : > { %s571_s2 = scalar_lea.sflag [#allocation4], %s101_s22  ;;  %s363_s3 = scalar_lea.hbm %s561_s27, 256 }
  0x17   : > { %p364_p1 = scmp.ne.s32.totalorder %s561_s27, %s363_s3  ;;  %p365_p2 = pneg %p567_p0 }
  0x18   : > { %s368_s12 = scalar_lea.hbm %s664_s0, 512  ;;  %p369_p4 = scmp.lt.u32.totalorder %s561_s27, %s664_s0 }
  0x19   : > { %p366_p3 = pnand %p365_p2, %p364_p1  ;;  %p370_p6 = scmp.lt.u32.totalorder %s368_s12, %s363_s3 }
  0x1a   : > { %p372_p10 = scmp.lt.u32.totalorder %s363_s3, %s561_s27 }
  0x1b   : > { %p367_p5 = pneg %p366_p3  ;;  %p371_p7 = por %p370_p6, %p369_p4 }
  0x1d   : > { %p373_p13 = por %p372_p10, %p371_p7 }
  0x1f   : > { %p374_p12 = pnand %p373_p13, %p367_p5 }
  0x21   : > { %377 = shalt.err (!%p374_p12)
}
  0x22   : > { %s378_s16 = scalar_lea.vmem %s563_s29, 256  ;;  %s477_s17 = smov [#allocation3]  }
  0x23   : > { %p379_p1 = scmp.ne.s32.totalorder %s563_s29, %s378_s16  ;;  %s383_s22 = sshll.u32 %s477_s17, 4  ;;  %s384_s22 = int_to_ptr.vmem [resolvable:$false] %s383_s22 }
  0x24   : > { %s385_s23 = scalar_lea.vmem %s384_s22, 512  ;;  %p386_p9 = scmp.lt.s32.totalorder %s563_s29, %s384_s22 }
  0x25   : > { %p381_p3 = pnand %p379_p1, %p365_p2  ;;  %p387_p4 = scmp.lt.s32.totalorder %s385_s23, %s378_s16 }
  0x27   : > { %p382_p11 = pneg %p381_p3  ;;  %p388_p6 = por %p387_p4, %p386_p9 }
  0x29   : > { %p389_p7 = pnand %p388_p6, %p382_p11 }
  0x2b   : > { %392 = shalt.err (!%p389_p7)
}
  0x2c   : > { %s478_s24 = smov 256   ;;  %s479_s25 = smov 128  }
  0x2d   : > { %s480_s26 = smov 8   ;;  %p291_p12 = scmp.ge.s32.totalorder %s475_s11, 1 }
  0x2e   : > { %305 = dma.hbm_to_vmem [thread:$0]  (!%p567_p0), %s561_s27, 256, %s563_s29, %s571_s2, %s478_s24, %s479_s25, %s480_s26  }
  0x2f   : > { %p121_p2 = scmp.lt.s32.totalorder %s475_s11, 3 }
  0x31   : > { %p122_p5 = pnand %p291_p12, %p121_p2 }
  0x32   : > { %s602_s28 = sand.u32 (!%p122_p5), 1, %s459_s7  }
  0x33   : > { %125 = sbr.rel (%p122_p5) target bundleno = 89 (0x59), region = 24  ;;  %s292_s3 = sshll.u32 (!%p122_p5), %s602_s28, 4 }
  0x34   : > { %s128_s4 = scalar_lea.sflag (!%p122_p5), [#allocation4], %s602_s28  ;;  %s131_s5 = scalar_lea.vmem (!%p122_p5), [#allocation3], %s292_s3 }
  0x3a   : > { %446 = dma.done.wait (%p539_p8), %s128_s4, 256  }
  0x3b   : > { %448 = vsyncadd (%p539_p8), %s128_s4, 4294967040  ;;  %v156_v0 = vld [vmem:[%s131_s5] sm:$0xff]  ;;  %v157_v1 = vld [vmem:[%s131_s5 + $0x8] sm:$0xff]  ;;  %s293_s27 = sshll.u32 %s602_s28, 1  ;;  %s295_s30 = sshll.u32 %s467_s9, 5  ;;  %vm187_vm0 = vcmask 1041409  }
  0x3c   : > { %v171_v2 = vrot.slane %v156_v0, 4  ;;  %v177_v3 = vrot.slane %v157_v1, 4  ;;  %s149_s18 = scalar_lea.vmem [#allocation6], %s293_s27  ;;  %s617_s13 = scalar_lea.hbm %s665_s1, %s295_s30 }
  0x3d   : > { %s205_s29 = sshll.u32 %s149_s18, 4  ;;  %s192_s15 = scalar_lea.sflag [#allocation5], %s602_s28  ;;  %s612_s29 = int_to_ptr.vmem [resolvable:$true] %s205_s29 }
  0x3e   : > { %v172_v4 = vadd.f32 %v171_v2, %v156_v0  ;;  %v178_v5 = vadd.f32 %v177_v3, %v157_v1  ;;  %s393_s16 = scalar_lea.vmem %s612_s29, 32  ;;  %p672_p9 = scmp.ne.s32.totalorder %s669_s19, 0 }
  0x3f   : > { %p394_p8 = scmp.ne.s32.totalorder %s612_s29, %s393_s16  ;;  %s481_s9 = smov [#allocation6]  }
  0x40   : > { %v173_v6 = vrot.slane %v172_v4, 2  ;;  %v179_v7 = vrot.slane %v178_v5, 2  ;;  %s397_s17 = sshll.u32 %s481_s9, 4  ;;  %s398_s17 = int_to_ptr.vmem [resolvable:$false] %s397_s17 }
  0x41   : > { %p395_p11 = pnand %p394_p8, %p672_p9  ;;  %s399_s22 = scalar_lea.vmem %s398_s17, 64 }
  0x42   : > { %v174_v8 = vadd.f32 %v173_v6, %v172_v4  ;;  %v180_v9 = vadd.f32 %v179_v7, %v178_v5  ;;  %p400_p10 = scmp.lt.s32.totalorder %s612_s29, %s398_s17  ;;  %p401_p13 = scmp.lt.s32.totalorder %s399_s22, %s393_s16 }
  0x43   : > { %p396_p0 = pneg %p395_p11 }
  0x44   : > { %v175_v10 = vrot.slane %v174_v8, 1  ;;  %v181_v11 = vrot.slane %v180_v9, 1  ;;  %p402_p1 = por %p401_p13, %p400_p10 }
  0x46   : > { %v176_v12 = vadd.f32 %v175_v10, %v174_v8  ;;  %v182_v13 = vadd.f32 %v181_v11, %v180_v9  ;;  %p403_p3 = pnand %p402_p1, %p396_p0 }
  0x48   : > { %v183_v14 = vmul.f32 0.125, %v176_v12  ;;  %v184_v15 = vmul.f32 0.125, %v182_v13 }
  0x4a   : > { %v188_v16 = vsel %vm187_vm0, %v184_v15, %v183_v14 }
  0x4b   : > { %190 = vst [vmem:[%s149_s18] sm:$0x3] %v188_v16 }
  0x4c   : > { %406 = shalt.err (!%p403_p3)
}
  0x4d   : > { %s407_s23 = scalar_lea.hbm %s617_s13, 32  ;;  %s411_s26 = scalar_lea.hbm %s665_s1, 64 }
  0x4e   : > { %p408_p4 = scmp.ne.s32.totalorder %s617_s13, %s407_s23  ;;  %p412_p12 = scmp.lt.u32.totalorder %s617_s13, %s665_s1 }
  0x4f   : > { %p413_p2 = scmp.lt.u32.totalorder %s411_s26, %s407_s23  ;;  %p415_p8 = scmp.lt.u32.totalorder %s407_s23, %s617_s13 }
  0x50   : > { %p409_p6 = pnand %p408_p4, %p672_p9 }
  0x51   : > { %p414_p5 = por %p413_p2, %p412_p12 }
  0x52   : > { %p410_p7 = pneg %p409_p6 }
  0x53   : > { %p416_p11 = por %p415_p8, %p414_p5 }
  0x55   : > { %p417_p0 = pnand %p416_p11, %p410_p7 }
  0x57   : > { %420 = shalt.err (!%p417_p0)
}
  0x58   : > { %300 = dma.vmem_to_hbm [thread:$0]  (%p672_p9), %s612_s29, 32, %s617_s13, %s192_s15  }
  0x59 PF: > { %s217_s4 = sand.u32 1, %s455_s6   ;;  %p673_p10 = scmp.ne.s32.totalorder %s670_s21, 0 }
  0x5a   : > { %p674_p13 = scmp.ge.s32.totalorder %s475_s11, 2  ;;  %s218_s5 = scalar_lea.sflag [#allocation5], %s217_s4 }
  0x5c   : > { %p307_p1 = pnand %p674_p13, %p673_p10 }
  0x5e   : > { %450 = dma.done.wait (!%p307_p1), %s218_s5, 32  }
  0x5f   : > { %452 = vsyncadd (!%p307_p1), %s218_s5, 4294967264  ;;  %s17_s11 = sadd.s32 1, %s475_s11   ;;  %s675_s6 = smov %s459_s7 }
  0x60   : > { %p14_p3 = scmp.ge.s32.totalorder %s17_s11, 4   ;;  %s676_s7 = smov %s463_s8 }
  0x61   : > { %s677_s8 = smov %s548_s20  ;;  %s678_s9 = smov %s471_s10 }
  0x62   : > { %s679_s10 = smov %s681_s14  ;;  %16 = sbr.rel (!%p14_p3) target bundleno = 6 (0x6), region = 77 }
  0x69   :  { %223 = vsyncpa [#allocation4], 1 }
  0x6a   :  { %225 = vsyncpa [#allocation4 + $0x1], 1 }
  0x6b   :  { %226 = vsyncpa [#allocation5], 1 }
  0x6c   :  { %228 = vsyncpa [#allocation5 + $0x1], 1 }

</bundles_post_ra>
